<compile_context>
chip_gen: v7x
topology: tpu7x:2x2x1
jax: 0.10.0
libtpu: 0.0.40
codegen_flags: <defaults>
</compile_context>

<pallas_src>
import math
from functools import partial

import jax
import jax.numpy as jnp
from jax import lax
from jax.experimental import pallas as pl
from jax.experimental.pallas import tpu as pltpu


# --------------------------------------------------------------------------
# Fused kernel: projections + per-head SDPA + output projection.
# Grid = (batch, q-tile).  Per-batch K-side work cached in VMEM scratch.
# --------------------------------------------------------------------------
def fused_attn_kernel(xq_ref, xk_ref, xv_ref,
                      qw_ref, qb_ref, kw_ref, kb_ref,
                      vw_ref, vb_ref, ow_ref, ob_ref,
                      o_ref,
                      kp_ref, vo_ref,
                      *, num_heads, approx_recip):
    f32 = jnp.float32
    mm = qw_ref.dtype                       # MXU operand dtype (f32 or bf16)
    D = kp_ref.shape[-1]                    # internal_dim
    E = ow_ref.shape[-1]                    # embedding_dim (output)
    dh = D // num_heads

    # ---- per-batch work: only on the first q-tile of each batch ----------
    @pl.when(pl.program_id(1) == 0)
    def _():
        kp = jnp.dot(xk_ref[...], kw_ref[...],
                     preferred_element_type=f32) + kb_ref[...]
        kp_ref[...] = kp.astype(mm)
        vp = (jnp.dot(xv_ref[...], vw_ref[...],
                      preferred_element_type=f32) + vb_ref[...]).astype(mm)
        # Re-associate (P @ V_h) @ Wo_h -> P @ (V_h @ Wo_h): cache the
        # per-head (Nk, E) factors so the per-q-tile matmuls are full-width
        # (K = Nk, N = E) instead of N = dh, and no head-concat is needed.
        for h in range(num_heads):          # static unroll; num_heads small
            sl = slice(h * dh, (h + 1) * dh)
            vo_ref[h] = jnp.dot(vp[:, sl], ow_ref[sl, :],
                                preferred_element_type=f32).astype(mm)

    # ---- per-q-tile work --------------------------------------------------
    # NOTE: 1/sqrt(head_dim) is pre-folded into qw/qb by the wrapper.
    qp = (jnp.dot(xq_ref[...], qw_ref[...],
                  preferred_element_type=f32) + qb_ref[...]).astype(mm)  # (tq, D)
    kp = kp_ref[...]                                                     # (Nk, D)

    y = jnp.zeros((qp.shape[0], E), dtype=f32)   # lane-dense (tq, E) accumulator
    for h in range(num_heads):                   # static unroll
        sl = slice(h * dh, (h + 1) * dh)
        # scores = q_h @ k_h^T expressed as a last-dim contraction (no
        # in-kernel transpose materialized).                         (tq, Nk)
        s = lax.dot_general(qp[:, sl], kp[:, sl], (((1,), (1,)), ((), ())),
                            preferred_element_type=f32)
        # numerically-stable softmax over keys (f32 math)
        m = jnp.max(s, axis=-1, keepdims=True)
        p = jnp.exp(s - m)
        inv_l = pl.reciprocal(jnp.sum(p, axis=-1, keepdims=True),
                              approx=approx_recip)               # EUP slot
        # full-width matmul (K = Nk, N = E); normalize AFTER the matmul.
        yh = jnp.dot(p.astype(mm), vo_ref[h], preferred_element_type=f32)
        y = y + yh * inv_l

    o_ref[...] = (y + ob_ref[...]).astype(o_ref.dtype)


@partial(jax.jit, static_argnames=("num_heads", "block_q", "out_dtype",
                                   "approx_recip"))
def fused_attention(q, k, v, q_w, q_b, k_w, k_b, v_w, v_b, o_w, o_b,
                    *, num_heads, block_q=256, out_dtype=jnp.float32,
                    approx_recip=True):
    """q: (B, Nq, E_in), k/v: (B, Nk, Ekv) -> (B, Nq, E_out)."""
    B, Nq, E_in = q.shape
    _, Nk, Ekv = k.shape
    D = q_w.shape[1]                    # internal_dim
    E_out = o_w.shape[1]
    cd = q_w.dtype                      # compute dtype (weights pre-cast)

    qc, kc, vc = q.astype(cd), k.astype(cd), v.astype(cd)

    tq = Nq if Nq <= block_q else block_q
    grid = (B, pl.cdiv(Nq, tq))

    def pin(shape):
        # Resident weight/bias: constant block index -> single buffer
        # (the second pipeline buffer would be pure VMEM waste).
        return pl.BlockSpec(shape, lambda b, i: (0,) * len(shape),
                            pipeline_mode=pl.Buffered(1))

    # Explicit scoped-VMEM limit derived from the actual footprint (+headroom).
    cd_b = jnp.dtype(cd).itemsize
    out_b = jnp.dtype(out_dtype).itemsize
    f32_b = 4
    vmem_need = (
        2 * tq * E_in * cd_b + 2 * 2 * Nk * Ekv * cd_b            # pipelined inputs
        + 2 * tq * E_out * out_b                                  # pipelined output
        + (E_in * D + 2 * Ekv * D + D * E_out) * cd_b             # weights (x1 buffer)
        + (3 * D + E_out) * f32_b                                 # biases
        + (Nk * D + num_heads * Nk * E_out) * cd_b                # persistent scratch
        + (tq * D + 2 * tq * Nk + 2 * Nk * D + 2 * tq * E_out) * f32_b)   # f32 temps
    vmem_limit = int(min(max(vmem_need * 2 + (2 << 20), 16 << 20), 100 << 20))

    kernel = partial(fused_attn_kernel, num_heads=num_heads,
                     approx_recip=approx_recip)
    return pl.pallas_call(
        kernel,
        out_shape=jax.ShapeDtypeStruct((B, Nq, E_out), out_dtype),
        grid_spec=pltpu.PrefetchScalarGridSpec(
            num_scalar_prefetch=0,
            grid=grid,
            in_specs=[
                pl.BlockSpec((pl.Squeezed(), tq, E_in), lambda b, i: (b, i, 0)),
                pl.BlockSpec((pl.Squeezed(), Nk, Ekv), lambda b, i: (b, 0, 0)),
                pl.BlockSpec((pl.Squeezed(), Nk, Ekv), lambda b, i: (b, 0, 0)),
                pin((E_in, D)), pin((1, D)),
                pin((Ekv, D)), pin((1, D)),
                pin((Ekv, D)), pin((1, D)),
                pin((D, E_out)), pin((1, E_out)),
            ],
            out_specs=pl.BlockSpec((pl.Squeezed(), tq, E_out),
                                   lambda b, i: (b, i, 0)),
            scratch_shapes=[
                pltpu.VMEM((Nk, D), cd),                    # projected K (per batch)
                pltpu.VMEM((num_heads, Nk, E_out), cd),     # per-head V_h @ Wo_h
            ]),
        compiler_params=pltpu.CompilerParams(
            # q-tile axis must stay sequential on one core (scratch carries
            # the cached K-proj / V@Wo across it); batch shards across TCs.
            dimension_semantics=("parallel", "arbitrary"),
            vmem_limit_bytes=vmem_limit),
    )(qc, kc, vc, q_w, q_b, k_w, k_b, v_w, v_b, o_w, o_b)


# --------------------------------------------------------------------------
# Attention module (forward only; eval mode => dropout_p = 0.0)
# --------------------------------------------------------------------------
class Attention:
    def __init__(self, embedding_dim, num_heads, downsample_rate=1,
                 dropout=0.0, kv_in_dim=None, key=None,
                 compute_dtype=jnp.bfloat16, out_dtype=jnp.float32,
                 block_q=256, approx_recip=True):
        self.embedding_dim = embedding_dim
        self.kv_in_dim = kv_in_dim if kv_in_dim is not None else embedding_dim
        self.internal_dim = embedding_dim // downsample_rate
        self.num_heads = num_heads
        assert self.internal_dim % num_heads == 0
        self.dropout_p = dropout            # eval mode: unused
        self.compute_dtype = compute_dtype
        self.out_dtype = out_dtype
        self.block_q = block_q
        self.approx_recip = approx_recip

        key = jax.random.PRNGKey(0) if key is None else key
        ks = jax.random.split(key, 8)

        def init_linear(kw, kb, in_dim, out_dim):
            bound = 1.0 / math.sqrt(in_dim)
            w = jax.random.uniform(kw, (in_dim, out_dim), jnp.float32, -bound, bound)
            b = jax.random.uniform(kb, (out_dim,), jnp.float32, -bound, bound)
            return w, b

        self.q_w, self.q_b = init_linear(ks[0], ks[1], embedding_dim, self.internal_dim)
        self.k_w, self.k_b = init_linear(ks[2], ks[3], self.kv_in_dim, self.internal_dim)
        self.v_w, self.v_b = init_linear(ks[4], ks[5], self.kv_in_dim, self.internal_dim)
        self.o_w, self.o_b = init_linear(ks[6], ks[7], self.internal_dim, embedding_dim)

        # Hoisted per-call weight prep: 1/sqrt(head_dim) folded into the q
        # projection, compute-dtype casts, (1, D) bias reshapes.  Done once.
        dh = self.internal_dim // num_heads
        scale = 1.0 / math.sqrt(dh)
        cd = compute_dtype
        self._qw = (self.q_w * scale).astype(cd)
        self._kw = self.k_w.astype(cd)
        self._vw = self.v_w.astype(cd)
        self._ow = self.o_w.astype(cd)
        self._qb = (self.q_b * scale).reshape(1, -1).astype(jnp.float32)
        self._kb = self.k_b.reshape(1, -1).astype(jnp.float32)
        self._vb = self.v_b.reshape(1, -1).astype(jnp.float32)
        self._ob = self.o_b.reshape(1, -1).astype(jnp.float32)

    # kept to mirror the original module's API (used by the reference path)
    def _separate_heads(self, x, num_heads):
        b, n, c = x.shape
        x = x.reshape(b, n, num_heads, c // num_heads)
        return jnp.transpose(x, (0, 2, 1, 3))

    def _recombine_heads(self, x):
        b, h, n, dh = x.shape
        return jnp.transpose(x, (0, 2, 1, 3)).reshape(b, n, h * dh)

    def __call__(self, q, k, v):
        return fused_attention(
            q, k, v,
            self._qw, self._qb, self._kw, self._kb,
            self._vw, self._vb, self._ow, self._ob,
            num_heads=self.num_heads, block_q=self.block_q,
            out_dtype=self.out_dtype, approx_recip=self.approx_recip)


# --------------------------------------------------------------------------
# Reference (pure-JAX, f32) forward for sanity checking
# --------------------------------------------------------------------------
def reference_forward(attn, q, k, v):
    B, Nq, _ = q.shape
    Nk = k.shape[1]
    qp = (q.reshape(B * Nq, -1) @ attn.q_w + attn.q_b).reshape(B, Nq, -1)
    kp = (k.reshape(B * Nk, -1) @ attn.k_w + attn.k_b).reshape(B, Nk, -1)
    vp = (v.reshape(B * Nk, -1) @ attn.v_w + attn.v_b).reshape(B, Nk, -1)
    qh = attn._separate_heads(qp, attn.num_heads)
    kh = attn._separate_heads(kp, attn.num_heads)
    vh = attn._separate_heads(vp, attn.num_heads)
    dh = qh.shape[-1]
    s = jnp.einsum("bhqd,bhkd->bhqk", qh, kh) / math.sqrt(dh)
    p = jax.nn.softmax(s, axis=-1)
    o = jnp.einsum("bhqk,bhkd->bhqd", p, vh)
    o = attn._recombine_heads(o)
    return (o.reshape(B * Nq, -1) @ attn.o_w + attn.o_b).reshape(B, Nq, -1)


if __name__ == "__main__":
    B, Nq, Nk = 2, 8, 8
    embedding_dim, num_heads = 32, 4

    key = jax.random.PRNGKey(0)
    kq, kk, kvv, kparams = jax.random.split(key, 4)
    q = jax.random.normal(kq, (B, Nq, embedding_dim), jnp.float32)
    k = jax.random.normal(kk, (B, Nk, embedding_dim), jnp.float32)
    v = jax.random.normal(kvv, (B, Nk, embedding_dim), jnp.float32)

    # 1) f32 compute path: tight check vs pure-JAX reference (tolerance covers
    #    the EUP approx-reciprocal in the softmax denominator).
    attn_f32 = Attention(embedding_dim, num_heads, key=kparams,
                         compute_dtype=jnp.float32)
    out = jax.block_until_ready(attn_f32(q, k, v))
    ref = reference_forward(attn_f32, q, k, v)
    assert out.shape == (B, Nq, embedding_dim)
    assert jnp.allclose(out, ref, atol=5e-3, rtol=5e-3), "f32 mismatch vs reference"

    # 2) multi-q-tile path: exercises the per-batch K-proj / V@Wo scratch
    #    carry across the "arbitrary" q-tile axis, incl. a non-divisible Nq.
    for nq2 in (16, 12):
        q2 = jax.random.normal(jax.random.PRNGKey(nq2),
                               (B, nq2, embedding_dim), jnp.float32)
        attn_t = Attention(embedding_dim, num_heads, key=kparams,
                           compute_dtype=jnp.float32, block_q=8)
        out2 = jax.block_until_ready(attn_t(q2, k, v))
        ref2 = reference_forward(attn_t, q2, k, v)
        assert out2.shape == (B, nq2, embedding_dim)
        assert jnp.allclose(out2, ref2, atol=5e-3, rtol=5e-3), f"tiled Nq={nq2} mismatch"

    # 3) default bf16 MXU path (f32 accumulation + f32 softmax): loose check.
    attn_bf16 = Attention(embedding_dim, num_heads, key=kparams)  # bf16 default
    out_bf16 = jax.block_until_ready(attn_bf16(q, k, v))
    assert out_bf16.shape == (B, Nq, embedding_dim)
    assert jnp.allclose(out_bf16, ref, atol=1e-1, rtol=1e-1), "bf16 mismatch vs reference"

    print("KERNEL_OK")
</pallas_src>

<mosaic_0001>
module attributes {stable_mosaic.version = 11 : i64} {
  func.func @fused_attn_kernel(%arg0: i32, %arg1: i32, %arg2: memref<1x8x32xf32, #tpu.memory_space<vmem>>, %arg3: memref<1x8x32xf32, #tpu.memory_space<vmem>>, %arg4: memref<1x8x32xf32, #tpu.memory_space<vmem>>, %arg5: memref<32x32xf32, #tpu.memory_space<vmem>>, %arg6: memref<1x32xf32, #tpu.memory_space<vmem>>, %arg7: memref<32x32xf32, #tpu.memory_space<vmem>>, %arg8: memref<1x32xf32, #tpu.memory_space<vmem>>, %arg9: memref<32x32xf32, #tpu.memory_space<vmem>>, %arg10: memref<1x32xf32, #tpu.memory_space<vmem>>, %arg11: memref<32x32xf32, #tpu.memory_space<vmem>>, %arg12: memref<1x32xf32, #tpu.memory_space<vmem>>, %arg13: memref<1x8x32xf32, #tpu.memory_space<vmem>>, %arg14: memref<8x32xf32, #tpu.memory_space<vmem>>, %arg15: memref<4x8x32xf32, #tpu.memory_space<vmem>>) attributes {dimension_semantics = [#tpu.dimension_semantics<parallel>, #tpu.dimension_semantics<arbitrary>], iteration_bounds = array<i64: 2, 1>, scalar_prefetch = 0 : i64, scratch_operands = 2 : i64, tpu.core_type = #tpu.core_type<tc>, window_params = [{transform_indices = @transform_0, window_bounds = array<i64: 1, 8, 32>}, {transform_indices = @transform_1, window_bounds = array<i64: 1, 8, 32>}, {transform_indices = @transform_2, window_bounds = array<i64: 1, 8, 32>}, {pipeline_mode = #tpu.pipeline_mode<synchronous>, transform_indices = @transform_3, window_bounds = array<i64: 32, 32>}, {pipeline_mode = #tpu.pipeline_mode<synchronous>, transform_indices = @transform_4, window_bounds = array<i64: 1, 32>}, {pipeline_mode = #tpu.pipeline_mode<synchronous>, transform_indices = @transform_5, window_bounds = array<i64: 32, 32>}, {pipeline_mode = #tpu.pipeline_mode<synchronous>, transform_indices = @transform_6, window_bounds = array<i64: 1, 32>}, {pipeline_mode = #tpu.pipeline_mode<synchronous>, transform_indices = @transform_7, window_bounds = array<i64: 32, 32>}, {pipeline_mode = #tpu.pipeline_mode<synchronous>, transform_indices = @transform_8, window_bounds = array<i64: 1, 32>}, {pipeline_mode = #tpu.pipeline_mode<synchronous>, transform_indices = @transform_9, window_bounds = array<i64: 32, 32>}, {pipeline_mode = #tpu.pipeline_mode<synchronous>, transform_indices = @transform_10, window_bounds = array<i64: 1, 32>}, {transform_indices = @transform_11, window_bounds = array<i64: 1, 8, 32>}]} {
    %c0_i32 = arith.constant 0 : i32
    %0 = arith.cmpi eq, %arg1, %c0_i32 : i32
    %1 = arith.extui %0 : i1 to i32
    %c0_i32_0 = arith.constant 0 : i32
    %2 = arith.cmpi ne, %1, %c0_i32_0 : i32
    scf.if %2 {
      %c0_40 = arith.constant 0 : index
      %c0_41 = arith.constant 0 : index
      %c0_42 = arith.constant 0 : index
      %86 = vector.load %arg3[%c0_40, %c0_41, %c0_42] : memref<1x8x32xf32, #tpu.memory_space<vmem>>, vector<1x8x32xf32>
      %87 = vector.shape_cast %86 : vector<1x8x32xf32> to vector<8x32xf32>
      %c0_43 = arith.constant 0 : index
      %c0_44 = arith.constant 0 : index
      %88 = vector.load %arg7[%c0_43, %c0_44] : memref<32x32xf32, #tpu.memory_space<vmem>>, vector<32x32xf32>
      %cst_45 = arith.constant dense<0.000000e+00> : vector<8x32xf32>
      %89 = tpu.matmul %87, %88, %cst_45 {dimension_numbers = #tpu.dot_dimension_numbers<[1], [0], [0], [1], [0, 0, 1, 1], [], []>} : vector<8x32xf32>, vector<32x32xf32>, vector<8x32xf32> -> vector<8x32xf32>
      %c0_46 = arith.constant 0 : index
      %c0_47 = arith.constant 0 : index
      %90 = vector.load %arg8[%c0_46, %c0_47] : memref<1x32xf32, #tpu.memory_space<vmem>>, vector<1x32xf32>
      %91 = vector.broadcast %90 : vector<1x32xf32> to vector<8x32xf32>
      %92 = arith.addf %89, %91 : vector<8x32xf32>
      %c0_48 = arith.constant 0 : index
      %c0_49 = arith.constant 0 : index
      %93 = vector.load %arg14[%c0_48, %c0_49] : memref<8x32xf32, #tpu.memory_space<vmem>>, vector<8x32xf32>
      tpu.vector_store %arg14[%c0_48, %c0_49], %92 {strides = array<i32>} : memref<8x32xf32, #tpu.memory_space<vmem>>, vector<8x32xf32>,
      %c0_50 = arith.constant 0 : index
      %c0_51 = arith.constant 0 : index
      %c0_52 = arith.constant 0 : index
      %94 = vector.load %arg4[%c0_50, %c0_51, %c0_52] : memref<1x8x32xf32, #tpu.memory_space<vmem>>, vector<1x8x32xf32>
      %95 = vector.shape_cast %94 : vector<1x8x32xf32> to vector<8x32xf32>
      %c0_53 = arith.constant 0 : index
      %c0_54 = arith.constant 0 : index
      %96 = vector.load %arg9[%c0_53, %c0_54] : memref<32x32xf32, #tpu.memory_space<vmem>>, vector<32x32xf32>
      %cst_55 = arith.constant dense<0.000000e+00> : vector<8x32xf32>
      %97 = tpu.matmul %95, %96, %cst_55 {dimension_numbers = #tpu.dot_dimension_numbers<[1], [0], [0], [1], [0, 0, 1, 1], [], []>} : vector<8x32xf32>, vector<32x32xf32>, vector<8x32xf32> -> vector<8x32xf32>
      %c0_56 = arith.constant 0 : index
      %c0_57 = arith.constant 0 : index
      %98 = vector.load %arg10[%c0_56, %c0_57] : memref<1x32xf32, #tpu.memory_space<vmem>>, vector<1x32xf32>
      %99 = vector.broadcast %98 : vector<1x32xf32> to vector<8x32xf32>
      %100 = arith.addf %97, %99 : vector<8x32xf32>
      %101 = vector.extract_strided_slice %100 {offsets = [0, 0], sizes = [8, 8], strides = [1, 1]} : vector<8x32xf32> to vector<8x8xf32>
      %c0_58 = arith.constant 0 : index
      %c0_59 = arith.constant 0 : index
      %102 = vector.load %arg11[%c0_58, %c0_59] : memref<32x32xf32, #tpu.memory_space<vmem>>, vector<8x32xf32>
      %cst_60 = arith.constant dense<0.000000e+00> : vector<8x32xf32>
      %103 = tpu.matmul %101, %102, %cst_60 {dimension_numbers = #tpu.dot_dimension_numbers<[1], [0], [0], [1], [0, 0, 1, 1], [], []>} : vector<8x8xf32>, vector<8x32xf32>, vector<8x32xf32> -> vector<8x32xf32>
      %c0_61 = arith.constant 0 : index
      %c0_62 = arith.constant 0 : index
      %c0_63 = arith.constant 0 : index
      %104 = vector.load %arg15[%c0_61, %c0_62, %c0_63] : memref<4x8x32xf32, #tpu.memory_space<vmem>>, vector<1x8x32xf32>
      %105 = vector.shape_cast %104 : vector<1x8x32xf32> to vector<8x32xf32>
      %106 = vector.shape_cast %103 : vector<8x32xf32> to vector<1x8x32xf32>
      tpu.vector_store %arg15[%c0_61, %c0_62, %c0_63], %106 {strides = array<i32>} : memref<4x8x32xf32, #tpu.memory_space<vmem>>, vector<1x8x32xf32>,
      %107 = vector.extract_strided_slice %100 {offsets = [0, 8], sizes = [8, 8], strides = [1, 1]} : vector<8x32xf32> to vector<8x8xf32>
      %c8 = arith.constant 8 : index
      %c0_64 = arith.constant 0 : index
      %108 = vector.load %arg11[%c8, %c0_64] : memref<32x32xf32, #tpu.memory_space<vmem>>, vector<8x32xf32>
      %cst_65 = arith.constant dense<0.000000e+00> : vector<8x32xf32>
      %109 = tpu.matmul %107, %108, %cst_65 {dimension_numbers = #tpu.dot_dimension_numbers<[1], [0], [0], [1], [0, 0, 1, 1], [], []>} : vector<8x8xf32>, vector<8x32xf32>, vector<8x32xf32> -> vector<8x32xf32>
      %c1_66 = arith.constant 1 : index
      %c0_67 = arith.constant 0 : index
      %c0_68 = arith.constant 0 : index
      %110 = vector.load %arg15[%c1_66, %c0_67, %c0_68] : memref<4x8x32xf32, #tpu.memory_space<vmem>>, vector<1x8x32xf32>
      %111 = vector.shape_cast %110 : vector<1x8x32xf32> to vector<8x32xf32>
      %112 = vector.shape_cast %109 : vector<8x32xf32> to vector<1x8x32xf32>
      tpu.vector_store %arg15[%c1_66, %c0_67, %c0_68], %112 {strides = array<i32>} : memref<4x8x32xf32, #tpu.memory_space<vmem>>, vector<1x8x32xf32>,
      %113 = vector.extract_strided_slice %100 {offsets = [0, 16], sizes = [8, 8], strides = [1, 1]} : vector<8x32xf32> to vector<8x8xf32>
      %c16 = arith.constant 16 : index
      %c0_69 = arith.constant 0 : index
      %114 = vector.load %arg11[%c16, %c0_69] : memref<32x32xf32, #tpu.memory_space<vmem>>, vector<8x32xf32>
      %cst_70 = arith.constant dense<0.000000e+00> : vector<8x32xf32>
      %115 = tpu.matmul %113, %114, %cst_70 {dimension_numbers = #tpu.dot_dimension_numbers<[1], [0], [0], [1], [0, 0, 1, 1], [], []>} : vector<8x8xf32>, vector<8x32xf32>, vector<8x32xf32> -> vector<8x32xf32>
      %c2_71 = arith.constant 2 : index
      %c0_72 = arith.constant 0 : index
      %c0_73 = arith.constant 0 : index
      %116 = vector.load %arg15[%c2_71, %c0_72, %c0_73] : memref<4x8x32xf32, #tpu.memory_space<vmem>>, vector<1x8x32xf32>
      %117 = vector.shape_cast %116 : vector<1x8x32xf32> to vector<8x32xf32>
      %118 = vector.shape_cast %115 : vector<8x32xf32> to vector<1x8x32xf32>
      tpu.vector_store %arg15[%c2_71, %c0_72, %c0_73], %118 {strides = array<i32>} : memref<4x8x32xf32, #tpu.memory_space<vmem>>, vector<1x8x32xf32>,
      %119 = vector.extract_strided_slice %100 {offsets = [0, 24], sizes = [8, 8], strides = [1, 1]} : vector<8x32xf32> to vector<8x8xf32>
      %c24 = arith.constant 24 : index
      %c0_74 = arith.constant 0 : index
      %120 = vector.load %arg11[%c24, %c0_74] : memref<32x32xf32, #tpu.memory_space<vmem>>, vector<8x32xf32>
      %cst_75 = arith.constant dense<0.000000e+00> : vector<8x32xf32>
      %121 = tpu.matmul %119, %120, %cst_75 {dimension_numbers = #tpu.dot_dimension_numbers<[1], [0], [0], [1], [0, 0, 1, 1], [], []>} : vector<8x8xf32>, vector<8x32xf32>, vector<8x32xf32> -> vector<8x32xf32>
      %c3_76 = arith.constant 3 : index
      %c0_77 = arith.constant 0 : index
      %c0_78 = arith.constant 0 : index
      %122 = vector.load %arg15[%c3_76, %c0_77, %c0_78] : memref<4x8x32xf32, #tpu.memory_space<vmem>>, vector<1x8x32xf32>
      %123 = vector.shape_cast %122 : vector<1x8x32xf32> to vector<8x32xf32>
      %124 = vector.shape_cast %121 : vector<8x32xf32> to vector<1x8x32xf32>
      tpu.vector_store %arg15[%c3_76, %c0_77, %c0_78], %124 {strides = array<i32>} : memref<4x8x32xf32, #tpu.memory_space<vmem>>, vector<1x8x32xf32>,
    } else {
    }
    %c0 = arith.constant 0 : index
    %c0_1 = arith.constant 0 : index
    %c0_2 = arith.constant 0 : index
    %3 = vector.load %arg2[%c0, %c0_1, %c0_2] : memref<1x8x32xf32, #tpu.memory_space<vmem>>, vector<1x8x32xf32>
    %4 = vector.shape_cast %3 : vector<1x8x32xf32> to vector<8x32xf32>
    %c0_3 = arith.constant 0 : index
    %c0_4 = arith.constant 0 : index
    %5 = vector.load %arg5[%c0_3, %c0_4] : memref<32x32xf32, #tpu.memory_space<vmem>>, vector<32x32xf32>
    %cst = arith.constant dense<0.000000e+00> : vector<8x32xf32>
    %6 = tpu.matmul %4, %5, %cst {dimension_numbers = #tpu.dot_dimension_numbers<[1], [0], [0], [1], [0, 0, 1, 1], [], []>} : vector<8x32xf32>, vector<32x32xf32>, vector<8x32xf32> -> vector<8x32xf32>
    %c0_5 = arith.constant 0 : index
    %c0_6 = arith.constant 0 : index
    %7 = vector.load %arg6[%c0_5, %c0_6] : memref<1x32xf32, #tpu.memory_space<vmem>>, vector<1x32xf32>
    %8 = vector.broadcast %7 : vector<1x32xf32> to vector<8x32xf32>
    %9 = arith.addf %6, %8 : vector<8x32xf32>
    %c0_7 = arith.constant 0 : index
    %c0_8 = arith.constant 0 : index
    %10 = vector.load %arg14[%c0_7, %c0_8] : memref<8x32xf32, #tpu.memory_space<vmem>>, vector<8x32xf32>
    %cst_9 = arith.constant 0.000000e+00 : f32
    %11 = vector.broadcast %cst_9 : f32 to vector<8x32xf32>
    %12 = vector.extract_strided_slice %9 {offsets = [0, 0], sizes = [8, 8], strides = [1, 1]} : vector<8x32xf32> to vector<8x8xf32>
    %13 = vector.extract_strided_slice %10 {offsets = [0, 0], sizes = [8, 8], strides = [1, 1]} : vector<8x32xf32> to vector<8x8xf32>
    %cst_10 = arith.constant dense<0.000000e+00> : vector<8x8xf32>
    %14 = tpu.matmul %12, %13, %cst_10 {dimension_numbers = #tpu.dot_dimension_numbers<[1], [1], [0], [0], [0, 0, 1, 0], [], []>} : vector<8x8xf32>, vector<8x8xf32>, vector<8x8xf32> -> vector<8x8xf32>
    %cst_11 = arith.constant dense<0xFF800000> : vector<8xf32>
    %15 = vector.multi_reduction <maximumf>, %14, %cst_11 [1] : vector<8x8xf32> to vector<8xf32>
    %16 = vector.shape_cast %15 : vector<8xf32> to vector<8x1xf32>
    %17 = vector.broadcast %16 : vector<8x1xf32> to vector<8x8xf32>
    %18 = arith.subf %14, %17 : vector<8x8xf32>
    %19 = math.exp %18 : vector<8x8xf32>
    %cst_12 = arith.constant dense<0.000000e+00> : vector<8xf32>
    %20 = vector.multi_reduction <add>, %19, %cst_12 [1] : vector<8x8xf32> to vector<8xf32>
    %21 = vector.shape_cast %20 : vector<8xf32> to vector<8x1xf32>
    %22 = tpu.reciprocal %21 {approx = true} : vector<8x1xf32> -> vector<8x1xf32>
    %c0_13 = arith.constant 0 : index
    %c0_14 = arith.constant 0 : index
    %c0_15 = arith.constant 0 : index
    %23 = vector.load %arg15[%c0_13, %c0_14, %c0_15] : memref<4x8x32xf32, #tpu.memory_space<vmem>>, vector<1x8x32xf32>
    %24 = vector.shape_cast %23 : vector<1x8x32xf32> to vector<8x32xf32>
    %cst_16 = arith.constant dense<0.000000e+00> : vector<8x32xf32>
    %25 = tpu.matmul %19, %24, %cst_16 {dimension_numbers = #tpu.dot_dimension_numbers<[1], [0], [0], [1], [0, 0, 1, 1], [], []>} : vector<8x8xf32>, vector<8x32xf32>, vector<8x32xf32> -> vector<8x32xf32>
    %26 = vector.broadcast %22 : vector<8x1xf32> to vector<8x32xf32>
    %27 = arith.mulf %25, %26 : vector<8x32xf32>
    %28 = arith.addf %11, %27 : vector<8x32xf32>
    %29 = vector.extract_strided_slice %9 {offsets = [0, 8], sizes = [8, 8], strides = [1, 1]} : vector<8x32xf32> to vector<8x8xf32>
    %30 = vector.extract_strided_slice %10 {offsets = [0, 8], sizes = [8, 8], strides = [1, 1]} : vector<8x32xf32> to vector<8x8xf32>
    %cst_17 = arith.constant dense<0.000000e+00> : vector<8x8xf32>
    %31 = tpu.matmul %29, %30, %cst_17 {dimension_numbers = #tpu.dot_dimension_numbers<[1], [1], [0], [0], [0, 0, 1, 0], [], []>} : vector<8x8xf32>, vector<8x8xf32>, vector<8x8xf32> -> vector<8x8xf32>
    %cst_18 = arith.constant dense<0xFF800000> : vector<8xf32>
    %32 = vector.multi_reduction <maximumf>, %31, %cst_18 [1] : vector<8x8xf32> to vector<8xf32>
    %33 = vector.shape_cast %32 : vector<8xf32> to vector<8x1xf32>
    %34 = vector.broadcast %33 : vector<8x1xf32> to vector<8x8xf32>
    %35 = arith.subf %31, %34 : vector<8x8xf32>
    %36 = math.exp %35 : vector<8x8xf32>
    %cst_19 = arith.constant dense<0.000000e+00> : vector<8xf32>
    %37 = vector.multi_reduction <add>, %36, %cst_19 [1] : vector<8x8xf32> to vector<8xf32>
    %38 = vector.shape_cast %37 : vector<8xf32> to vector<8x1xf32>
    %39 = tpu.reciprocal %38 {approx = true} : vector<8x1xf32> -> vector<8x1xf32>
    %c1 = arith.constant 1 : index
    %c0_20 = arith.constant 0 : index
    %c0_21 = arith.constant 0 : index
    %40 = vector.load %arg15[%c1, %c0_20, %c0_21] : memref<4x8x32xf32, #tpu.memory_space<vmem>>, vector<1x8x32xf32>
    %41 = vector.shape_cast %40 : vector<1x8x32xf32> to vector<8x32xf32>
    %cst_22 = arith.constant dense<0.000000e+00> : vector<8x32xf32>
    %42 = tpu.matmul %36, %41, %cst_22 {dimension_numbers = #tpu.dot_dimension_numbers<[1], [0], [0], [1], [0, 0, 1, 1], [], []>} : vector<8x8xf32>, vector<8x32xf32>, vector<8x32xf32> -> vector<8x32xf32>
    %43 = vector.broadcast %39 : vector<8x1xf32> to vector<8x32xf32>
    %44 = arith.mulf %42, %43 : vector<8x32xf32>
    %45 = arith.addf %28, %44 : vector<8x32xf32>
    %46 = vector.extract_strided_slice %9 {offsets = [0, 16], sizes = [8, 8], strides = [1, 1]} : vector<8x32xf32> to vector<8x8xf32>
    %47 = vector.extract_strided_slice %10 {offsets = [0, 16], sizes = [8, 8], strides = [1, 1]} : vector<8x32xf32> to vector<8x8xf32>
    %cst_23 = arith.constant dense<0.000000e+00> : vector<8x8xf32>
    %48 = tpu.matmul %46, %47, %cst_23 {dimension_numbers = #tpu.dot_dimension_numbers<[1], [1], [0], [0], [0, 0, 1, 0], [], []>} : vector<8x8xf32>, vector<8x8xf32>, vector<8x8xf32> -> vector<8x8xf32>
    %cst_24 = arith.constant dense<0xFF800000> : vector<8xf32>
    %49 = vector.multi_reduction <maximumf>, %48, %cst_24 [1] : vector<8x8xf32> to vector<8xf32>
    %50 = vector.shape_cast %49 : vector<8xf32> to vector<8x1xf32>
    %51 = vector.broadcast %50 : vector<8x1xf32> to vector<8x8xf32>
    %52 = arith.subf %48, %51 : vector<8x8xf32>
    %53 = math.exp %52 : vector<8x8xf32>
    %cst_25 = arith.constant dense<0.000000e+00> : vector<8xf32>
    %54 = vector.multi_reduction <add>, %53, %cst_25 [1] : vector<8x8xf32> to vector<8xf32>
    %55 = vector.shape_cast %54 : vector<8xf32> to vector<8x1xf32>
    %56 = tpu.reciprocal %55 {approx = true} : vector<8x1xf32> -> vector<8x1xf32>
    %c2 = arith.constant 2 : index
    %c0_26 = arith.constant 0 : index
    %c0_27 = arith.constant 0 : index
    %57 = vector.load %arg15[%c2, %c0_26, %c0_27] : memref<4x8x32xf32, #tpu.memory_space<vmem>>, vector<1x8x32xf32>
    %58 = vector.shape_cast %57 : vector<1x8x32xf32> to vector<8x32xf32>
    %cst_28 = arith.constant dense<0.000000e+00> : vector<8x32xf32>
    %59 = tpu.matmul %53, %58, %cst_28 {dimension_numbers = #tpu.dot_dimension_numbers<[1], [0], [0], [1], [0, 0, 1, 1], [], []>} : vector<8x8xf32>, vector<8x32xf32>, vector<8x32xf32> -> vector<8x32xf32>
    %60 = vector.broadcast %56 : vector<8x1xf32> to vector<8x32xf32>
    %61 = arith.mulf %59, %60 : vector<8x32xf32>
    %62 = arith.addf %45, %61 : vector<8x32xf32>
    %63 = vector.extract_strided_slice %9 {offsets = [0, 24], sizes = [8, 8], strides = [1, 1]} : vector<8x32xf32> to vector<8x8xf32>
    %64 = vector.extract_strided_slice %10 {offsets = [0, 24], sizes = [8, 8], strides = [1, 1]} : vector<8x32xf32> to vector<8x8xf32>
    %cst_29 = arith.constant dense<0.000000e+00> : vector<8x8xf32>
    %65 = tpu.matmul %63, %64, %cst_29 {dimension_numbers = #tpu.dot_dimension_numbers<[1], [1], [0], [0], [0, 0, 1, 0], [], []>} : vector<8x8xf32>, vector<8x8xf32>, vector<8x8xf32> -> vector<8x8xf32>
    %cst_30 = arith.constant dense<0xFF800000> : vector<8xf32>
    %66 = vector.multi_reduction <maximumf>, %65, %cst_30 [1] : vector<8x8xf32> to vector<8xf32>
    %67 = vector.shape_cast %66 : vector<8xf32> to vector<8x1xf32>
    %68 = vector.broadcast %67 : vector<8x1xf32> to vector<8x8xf32>
    %69 = arith.subf %65, %68 : vector<8x8xf32>
    %70 = math.exp %69 : vector<8x8xf32>
    %cst_31 = arith.constant dense<0.000000e+00> : vector<8xf32>
    %71 = vector.multi_reduction <add>, %70, %cst_31 [1] : vector<8x8xf32> to vector<8xf32>
    %72 = vector.shape_cast %71 : vector<8xf32> to vector<8x1xf32>
    %73 = tpu.reciprocal %72 {approx = true} : vector<8x1xf32> -> vector<8x1xf32>
    %c3 = arith.constant 3 : index
    %c0_32 = arith.constant 0 : index
    %c0_33 = arith.constant 0 : index
    %74 = vector.load %arg15[%c3, %c0_32, %c0_33] : memref<4x8x32xf32, #tpu.memory_space<vmem>>, vector<1x8x32xf32>
    %75 = vector.shape_cast %74 : vector<1x8x32xf32> to vector<8x32xf32>
    %cst_34 = arith.constant dense<0.000000e+00> : vector<8x32xf32>
    %76 = tpu.matmul %70, %75, %cst_34 {dimension_numbers = #tpu.dot_dimension_numbers<[1], [0], [0], [1], [0, 0, 1, 1], [], []>} : vector<8x8xf32>, vector<8x32xf32>, vector<8x32xf32> -> vector<8x32xf32>
    %77 = vector.broadcast %73 : vector<8x1xf32> to vector<8x32xf32>
    %78 = arith.mulf %76, %77 : vector<8x32xf32>
    %79 = arith.addf %62, %78 : vector<8x32xf32>
    %c0_35 = arith.constant 0 : index
    %c0_36 = arith.constant 0 : index
    %80 = vector.load %arg12[%c0_35, %c0_36] : memref<1x32xf32, #tpu.memory_space<vmem>>, vector<1x32xf32>
    %81 = vector.broadcast %80 : vector<1x32xf32> to vector<8x32xf32>
    %82 = arith.addf %79, %81 : vector<8x32xf32>
    %c0_37 = arith.constant 0 : index
    %c0_38 = arith.constant 0 : index
    %c0_39 = arith.constant 0 : index
    %83 = vector.load %arg13[%c0_37, %c0_38, %c0_39] : memref<1x8x32xf32, #tpu.memory_space<vmem>>, vector<1x8x32xf32>
    %84 = vector.shape_cast %83 : vector<1x8x32xf32> to vector<8x32xf32>
    %85 = vector.shape_cast %82 : vector<8x32xf32> to vector<1x8x32xf32>
    tpu.vector_store %arg13[%c0_37, %c0_38, %c0_39], %85 {strides = array<i32>} : memref<1x8x32xf32, #tpu.memory_space<vmem>>, vector<1x8x32xf32>,
    return
  }
  func.func @transform_0(%arg0: i32, %arg1: i32) -> (i32, i32, i32) {
    %c0_i32 = arith.constant 0 : i32
    %c0_i32_0 = arith.constant 0 : i32
    return %arg0, %arg1, %c0_i32 : i32, i32, i32
  }
  func.func @transform_1(%arg0: i32, %arg1: i32) -> (i32, i32, i32) {
    %c0_i32 = arith.constant 0 : i32
    %c0_i32_0 = arith.constant 0 : i32
    %c0_i32_1 = arith.constant 0 : i32
    return %arg0, %c0_i32, %c0_i32_0 : i32, i32, i32
  }
  func.func @transform_2(%arg0: i32, %arg1: i32) -> (i32, i32, i32) {
    %c0_i32 = arith.constant 0 : i32
    %c0_i32_0 = arith.constant 0 : i32
    %c0_i32_1 = arith.constant 0 : i32
    return %arg0, %c0_i32, %c0_i32_0 : i32, i32, i32
  }
  func.func @transform_3(%arg0: i32, %arg1: i32) -> (i32, i32) {
    %c0_i32 = arith.constant 0 : i32
    %c0_i32_0 = arith.constant 0 : i32
    %c0_i32_1 = arith.constant 0 : i32
    return %c0_i32, %c0_i32_0 : i32, i32
  }
  func.func @transform_4(%arg0: i32, %arg1: i32) -> (i32, i32) {
    %c0_i32 = arith.constant 0 : i32
    %c0_i32_0 = arith.constant 0 : i32
    %c0_i32_1 = arith.constant 0 : i32
    return %c0_i32, %c0_i32_0 : i32, i32
  }
  func.func @transform_5(%arg0: i32, %arg1: i32) -> (i32, i32) {
    %c0_i32 = arith.constant 0 : i32
    %c0_i32_0 = arith.constant 0 : i32
    %c0_i32_1 = arith.constant 0 : i32
    return %c0_i32, %c0_i32_0 : i32, i32
  }
  func.func @transform_6(%arg0: i32, %arg1: i32) -> (i32, i32) {
    %c0_i32 = arith.constant 0 : i32
    %c0_i32_0 = arith.constant 0 : i32
    %c0_i32_1 = arith.constant 0 : i32
    return %c0_i32, %c0_i32_0 : i32, i32
  }
  func.func @transform_7(%arg0: i32, %arg1: i32) -> (i32, i32) {
    %c0_i32 = arith.constant 0 : i32
    %c0_i32_0 = arith.constant 0 : i32
    %c0_i32_1 = arith.constant 0 : i32
    return %c0_i32, %c0_i32_0 : i32, i32
  }
  func.func @transform_8(%arg0: i32, %arg1: i32) -> (i32, i32) {
    %c0_i32 = arith.constant 0 : i32
    %c0_i32_0 = arith.constant 0 : i32
    %c0_i32_1 = arith.constant 0 : i32
    return %c0_i32, %c0_i32_0 : i32, i32
  }
  func.func @transform_9(%arg0: i32, %arg1: i32) -> (i32, i32) {
    %c0_i32 = arith.constant 0 : i32
    %c0_i32_0 = arith.constant 0 : i32
    %c0_i32_1 = arith.constant 0 : i32
    return %c0_i32, %c0_i32_0 : i32, i32
  }
  func.func @transform_10(%arg0: i32, %arg1: i32) -> (i32, i32) {
    %c0_i32 = arith.constant 0 : i32
    %c0_i32_0 = arith.constant 0 : i32
    %c0_i32_1 = arith.constant 0 : i32
    return %c0_i32, %c0_i32_0 : i32, i32
  }
  func.func @transform_11(%arg0: i32, %arg1: i32) -> (i32, i32, i32) {
    %c0_i32 = arith.constant 0 : i32
    %c0_i32_0 = arith.constant 0 : i32
    return %arg0, %arg1, %c0_i32 : i32, i32, i32
  }
}

</mosaic_0001>

<bundles_post_ra>
// kernel: fused_attention.1
= control target key start
LH: loop header
LB: loop body
LE: loop exit
PB: predicated region body
PF: predicated region fallthrough
CT: control target
= control target key end

     0   :  { %s3164_s0 = inlined_call_operand.hbm [shape: f32[2,8,32], index: 0, kind: input, shape index: {}]   ;;  %s3165_s1 = inlined_call_operand.hbm [shape: f32[2,8,32], index: 1, kind: input, shape index: {}]   ;;  %s3166_s2 = inlined_call_operand.hbm [shape: f32[2,8,32], index: 2, kind: input, shape index: {}]   ;;  %s3167_s3 = inlined_call_operand.hbm [shape: f32[32,32], index: 3, kind: input, shape index: {}]   ;;  %s3168_s4 = inlined_call_operand.vmem [shape: f32[1,32], index: 4, kind: input, shape index: {}]   ;;  %s3169_s5 = inlined_call_operand.hbm [shape: f32[32,32], index: 5, kind: input, shape index: {}]   ;;  %s3170_s6 = inlined_call_operand.vmem [shape: f32[1,32], index: 6, kind: input, shape index: {}]   ;;  %s3171_s7 = inlined_call_operand.hbm [shape: f32[32,32], index: 7, kind: input, shape index: {}]   ;;  %s3172_s8 = inlined_call_operand.hbm [shape: f32[1,32], index: 8, kind: input, shape index: {}]   ;;  %s3173_s9 = inlined_call_operand.vmem [shape: f32[32,32], index: 9, kind: input, shape index: {}]   ;;  %s3174_s10 = inlined_call_operand.vmem [shape: f32[1,32], index: 10, kind: input, shape index: {}]   ;;  %s3175_s11 = inlined_call_operand.hbm [shape: f32[2,8,32], index: 11, kind: output, shape index: {}]  }
   0x1   :  { %3200 = sst [smem:[#allocation30_spill]] %s3165_s1 }
   0x2   :  { %3201 = sst [smem:[#allocation31_spill]] %s3167_s3 }
   0x3   :  { %3202 = sst [smem:[#allocation32_spill]] %s3168_s4 }
   0x4   :  { %3203 = sst [smem:[#allocation33_spill]] %s3171_s7 }
   0x5   :  { %3204 = sst [smem:[#allocation34_spill]] %s3174_s10 }
   0x6   :  { %3205 = sst [smem:[#allocation35_spill]] %s3175_s11 }
   0x7   :  { %16 = vsyncpa [#allocation5], 0 }
   0x8   :  { %18 = vsyncpa [#allocation5 + $0x1], 0 }
   0x9   :  { %19 = vsyncpa [#allocation8], 0 }
   0xa   :  { %21 = vsyncpa [#allocation8 + $0x1], 0 }
   0xb   :  { %22 = vsyncpa [#allocation11], 0 }
   0xc   :  { %23 = vsyncpa [#allocation14], 0 }
   0xd   :  { %24 = vsyncpa [#allocation6], 0 }
   0xe   :  { %26 = vsyncpa [#allocation6 + $0x1], 0  ;;  %s2670_s17 = smov 0   ;;  %s2672_s18 = smov 0  }
   0xf   :  { %s2674_s19 = smov 0   ;;  %s2676_s20 = smov 0  }
  0x10   :  { %s2678_s21 = smov 0   ;;  %s2680_s22 = smov 0  }
  0x11 LB: > { %3206 = sst [smem:[#allocation22_spill]] %s2572_s17  ;;  %s2701_s23 = sadd.s32 4294967295, %s2592_s22   ;;  %s2592_s22 = sphi %s2680_s22, %s32_s22   ;;  %s2588_s21 = sphi %s2678_s21, %s3253_s21   ;;  %s2584_s20 = sphi %s2676_s20, %s3252_s20   ;;  %s2580_s19 = sphi %s2674_s19, %s3256_s19   ;;  %s2576_s18 = sphi %s2672_s18, %s3255_s18   ;;  %s2572_s17 = sphi %s2670_s17, %s3254_s17  }
  0x12   : > { %3207 = sst [smem:[#allocation23_spill]] %s2584_s20  ;;  %p1961_p0 = scmp.ge.s32.totalorder %s2592_s22, 1 }
  0x13   : > { %3208 = sst [smem:[#allocation24_spill]] %s2588_s21  ;;  %p3184_p1 = scmp.eq.s32.totalorder %s2701_s23, 0 }
  0x14   : > { %3209 = sst [smem:[#allocation25_spill]] %s2592_s22  ;;  %p325_p2 = scmp.lt.s32.totalorder %s2592_s22, 3 }
  0x15   : > { %s2594_s25 = smov [#allocation10]   ;;  %s2595_s28 = smov [#allocation13]  }
  0x16   : > { %p2706_p3 = pnand %p1961_p0, %p325_p2  ;;  %s337_s26 = sshll.u32 %s2594_s25, 4  ;;  %s2710_s26 = int_to_ptr.vmem [resolvable:$true] %s337_s26 }
  0x17   : > { %s369_s29 = sshll.u32 %s2595_s28, 4  ;;  %s3212_s3 = sld [smem:[#allocation31_spill]]  ;;  %s2721_s29 = int_to_ptr.vmem [resolvable:$true] %s369_s29 }
  0x18   : > { %s3210_s24 = scalar_select %p2706_p3, 1, 0 }
  0x19   : > { %p2183_p4 = pneg %p2706_p3 }
  0x1b   : > { %p2717_p6 = pnand %p2183_p4, %p3184_p1 }
  0x1d   : > { %s3211_s27 = scalar_select %p2717_p6, 1, 0 }
  0x1e   : > { %s2296_s13 = scalar_lea.hbm %s3212_s3, 512  ;;  %p2731_p8 = pneg %p2717_p6 }
  0x1f   : > { %p2297_p7 = scmp.ne.s32.totalorder %s3212_s3, %s2296_s13  ;;  %p2303_p11 = scmp.lt.u32.totalorder %s2296_s13, %s3212_s3 }
  0x20   : > { %s3213_s16 = scalar_select %p2731_p8, 1, 0 }
  0x21   : > { %p2299_p9 = pnand %p2731_p8, %p2297_p7 }
  0x23   : > { %p2300_p10 = pneg %p2299_p9 }
  0x25   : > { %p2305_p12 = pnand %p2303_p11, %p2300_p10 }
  0x27   : > { %2308 = shalt.err (!%p2305_p12)
}
  0x28   : > { %s2309_s30 = scalar_lea.vmem %s2710_s26, 512  ;;  %p2317_p4 = scmp.lt.s32.totalorder %s2710_s26, %s2710_s26 }
  0x29   : > { %p2310_p13 = scmp.ne.s32.totalorder %s2710_s26, %s2309_s30  ;;  %p2318_p5 = scmp.lt.s32.totalorder %s2309_s30, %s2309_s30 }
  0x2b   : > { %p2312_p0 = pnand %p2310_p13, %p2731_p8  ;;  %p2319_p7 = por %p2318_p5, %p2317_p4 }
  0x2d   : > { %p2313_p2 = pneg %p2312_p0 }
  0x2f   : > { %p2320_p9 = pnand %p2319_p7, %p2313_p2 }
  0x31   : > { %2323 = shalt.err (!%p2320_p9)
}
  0x32   : > { %s3177_s12 = smov 128   ;;  %s3178_s13 = smov 8  }
  0x33   : > { %2186 = dma.hbm_to_vmem [thread:$0]  (!%p2717_p6), %s3212_s3, 512, %s2710_s26, [#allocation11], %s3177_s12, %s3177_s12, %s3178_s13  }
  0x34   : > { %s3214_s7 = sld [smem:[#allocation33_spill]] }
  0x3a   : > { %s2324_s30 = scalar_lea.hbm %s3214_s7, 512 }
  0x3b   : > { %p2325_p5 = scmp.ne.s32.totalorder %s3214_s7, %s2324_s30  ;;  %p2331_p12 = scmp.lt.u32.totalorder %s2324_s30, %s3214_s7 }
  0x3d   : > { %p2327_p10 = pnand %p2325_p5, %p2731_p8 }
  0x3f   : > { %p2328_p11 = pneg %p2327_p10 }
  0x41   : > { %p2333_p13 = pnand %p2331_p12, %p2328_p11 }
  0x43   : > { %2336 = shalt.err (!%p2333_p13)
}
  0x44   : > { %s2337_s26 = scalar_lea.vmem %s2721_s29, 512  ;;  %p2345_p7 = scmp.lt.s32.totalorder %s2721_s29, %s2721_s29 }
  0x45   : > { %p2338_p0 = scmp.ne.s32.totalorder %s2721_s29, %s2337_s26  ;;  %p2346_p9 = scmp.lt.s32.totalorder %s2337_s26, %s2337_s26 }
  0x47   : > { %p2340_p2 = pnand %p2338_p0, %p2731_p8  ;;  %p2347_p5 = por %p2346_p9, %p2345_p7 }
  0x49   : > { %p2341_p4 = pneg %p2340_p2 }
  0x4b   : > { %p2348_p10 = pnand %p2347_p5, %p2341_p4 }
  0x4d   : > { %2351 = shalt.err (!%p2348_p10)
}
  0x4e   : > { %2192 = dma.hbm_to_vmem [thread:$0]  (!%p2717_p6), %s3214_s7, 512, %s2721_s29, [#allocation14], %s3177_s12, %s3177_s12, %s3178_s13  }
  0x4f   : > { %s1960_s11 = sadd.s32 4294967294, %s2592_s22   ;;  %s44_s20 = sadd.s32 1, %s2588_s21 }
  0x50   : > { %p46_p11 = scmp.ge.s32.totalorder %s44_s20, 2  ;;  %s53_s14 = sadd.s32 1, %s2580_s19 }
  0x51   : > { %p60_p12 = scmp.ne.s32.totalorder %s2580_s19, %s2576_s18  ;;  %p61_p13 = scmp.eq.s32.totalorder %s2592_s22, 0 }
  0x52   : > { %s3258_s20 = smov (%p46_p11, %s44_s20), 0  ;;  %p66_p2 = scmp.ne.s32.totalorder %s2576_s18, %s2572_s17 }
  0x53   : > { %3215 = sst [smem:[#allocation26_spill]] %s3258_s20  ;;  %p2789_p0 = por %p61_p13, %p60_p12 }
  0x54   : > { %s48_s29 = ssub.s32 %s2588_s21, %s3258_s20  ;;  %p312_p4 = scmp.eq.s32.totalorder %s2701_s23, 1 }
  0x55   : > { %p51_p7 = scmp.eq.s32.totalorder %s48_s29, 0  ;;  %p2800_p9 = por %p3184_p1, %p66_p2 }
  0x56   : > { %p2804_p5 = por %p312_p4, %p60_p12  ;;  %p318_p10 = scmp.eq.s32.totalorder %s1960_s11, 1 }
  0x57   : > { %s3217_s25 = scalar_select %p2800_p9, 1, 0 }
  0x58   : > { %s3218_s28 = scalar_select %p2804_p5, 1, 0 }
  0x59   : > { %s2809_s30 = scalar_select %p51_p7, %s2580_s19, %s53_s14  }
  0x5a   : > { %3219 = sst [smem:[#allocation27_spill]] %s3218_s28  ;;  %p2811_p11 = por %p318_p10, %p66_p2 }
  0x5b   : > { %3220 = sst [smem:[#allocation28_spill]] %s2809_s30  ;;  %p2214_p13 = scmp.lt.s32.totalorder %s2592_s22, 2 }
  0x5c   : > { %s3221_s26 = scalar_select %p2811_p11, 1, 0 }
  0x5d   : > { %s3179_s4 = sand.u32 1, %s2580_s19   ;;  %s2818_s10 = sshll.u32 %s2588_s21, 7 }
  0x5e   : > { %3222 = sst [smem:[#allocation29_spill]] %s3221_s26  ;;  %s2822_s29 = sshll.u32 %s3179_s4, 3 }
  0x5f   : > { %p2826_p12 = pnand %p2214_p13, %p2789_p0  ;;  %s419_s11 = sand.u32 1, %s2592_s22  }
  0x60   : > { %s3224_s1 = sld [smem:[#allocation30_spill]]  ;;  %s423_s7 = scalar_lea.vmem [#allocation7], %s2822_s29 }
  0x61   : > { %s3223_s12 = scalar_select %p2826_p12, 1, 0 }
  0x62   : > { %s430_s4 = sshll.u32 %s423_s7, 4  ;;  %s2840_s15 = scalar_lea.sflag [#allocation8], %s419_s11  ;;  %s2838_s4 = int_to_ptr.vmem [resolvable:$true] %s430_s4 }
  0x63   : > { %p2846_p2 = pneg %p2826_p12 }
  0x65   : > { %s3225_s21 = scalar_select %p2846_p2, 1, 0 }
  0x66   : > { %s2835_s3 = scalar_lea.hbm %s3224_s1, %s2818_s10  ;;  %s2357_s30 = scalar_lea.hbm %s3224_s1, 256 }
  0x67   : > { %s2352_s20 = scalar_lea.hbm %s2835_s3, 128  ;;  %p2358_p10 = scmp.lt.u32.totalorder %s2835_s3, %s3224_s1 }
  0x68   : > { %p2353_p0 = scmp.ne.s32.totalorder %s2835_s3, %s2352_s20  ;;  %p2359_p13 = scmp.lt.u32.totalorder %s2357_s30, %s2352_s20 }
  0x69   : > { %p2361_p11 = scmp.lt.u32.totalorder %s2352_s20, %s2835_s3 }
  0x6a   : > { %p2355_p4 = pnand %p2846_p2, %p2353_p0  ;;  %p2360_p1 = por %p2359_p13, %p2358_p10 }
  0x6c   : > { %p2356_p7 = pneg %p2355_p4  ;;  %p2362_p5 = por %p2361_p11, %p2360_p1 }
  0x6e   : > { %p2363_p9 = pnand %p2362_p5, %p2356_p7 }
  0x70   : > { %2366 = shalt.err (!%p2363_p9)
}
  0x71   : > { %s2367_s11 = scalar_lea.vmem %s2838_s4, 128  ;;  %s2598_s13 = smov [#allocation7]  }
  0x72   : > { %p2368_p0 = scmp.ne.s32.totalorder %s2838_s4, %s2367_s11  ;;  %s2372_s14 = sshll.u32 %s2598_s13, 4  ;;  %s2373_s14 = int_to_ptr.vmem [resolvable:$false] %s2372_s14 }
  0x73   : > { %s2374_s22 = scalar_lea.vmem %s2373_s14, 256  ;;  %p2375_p6 = scmp.lt.s32.totalorder %s2838_s4, %s2373_s14 }
  0x74   : > { %p2370_p4 = pnand %p2368_p0, %p2846_p2  ;;  %p2376_p8 = scmp.lt.s32.totalorder %s2374_s22, %s2367_s11 }
  0x76   : > { %p2371_p3 = pneg %p2370_p4  ;;  %p2377_p10 = por %p2376_p8, %p2375_p6 }
  0x78   : > { %p2378_p13 = pnand %p2377_p10, %p2371_p3 }
  0x7a   : > { %2381 = shalt.err (!%p2378_p13)
}
  0x7b   : > { %2202 = dma.hbm_to_vmem [thread:$0]  (!%p2826_p12), %s2835_s3, 128, %s2838_s4, %s2840_s15  }
  0x7c   : > { %s2599_s20 = smov [#allocation12]   ;;  %s2600_s7 = smov [#allocation15]  }
  0x7d   : > { %s353_s30 = sshll.u32 %s2599_s20, 4  ;;  %s383_s1 = sshll.u32 %s2600_s7, 4  ;;  %s354_s30 = int_to_ptr.vmem [resolvable:$true] %s353_s30  ;;  %s384_s1 = int_to_ptr.vmem [resolvable:$true] %s383_s1 }
  0x7e   : > { %s2382_s14 = scalar_lea.hbm %s3169_s5, 512  ;;  %p3226_p3 = scmp.ne.s32.totalorder %s3213_s16, 0 }
  0x7f   : > { %p2383_p1 = scmp.ne.s32.totalorder %s3169_s5, %s2382_s14  ;;  %p2389_p9 = scmp.lt.u32.totalorder %s2382_s14, %s3169_s5 }
  0x81   : > { %p2385_p6 = pnand %p2383_p1, %p3226_p3 }
  0x83   : > { %p2386_p8 = pneg %p2385_p6 }
  0x85   : > { %p2391_p5 = pnand %p2389_p9, %p2386_p8 }
  0x87   : > { %2394 = shalt.err (!%p2391_p5)
}
  0x88   : > { %s2395_s3 = scalar_lea.vmem %s354_s30, 512  ;;  %p2403_p4 = scmp.lt.s32.totalorder %s354_s30, %s354_s30 }
  0x89   : > { %p2396_p11 = scmp.ne.s32.totalorder %s354_s30, %s2395_s3  ;;  %p2404_p10 = scmp.lt.s32.totalorder %s2395_s3, %s2395_s3 }
  0x8b   : > { %p2398_p7 = pnand %p2396_p11, %p3226_p3  ;;  %p2405_p13 = por %p2404_p10, %p2403_p4 }
  0x8d   : > { %p2399_p0 = pneg %p2398_p7 }
  0x8f   : > { %p2406_p12 = pnand %p2405_p13, %p2399_p0 }
  0x91   : > { %2409 = shalt.err (!%p2406_p12)
}
  0x92   : > { %p3227_p1 = scmp.ne.s32.totalorder %s3211_s27, 0  ;;  %s3228_s26 = smov 8  }
  0x93   : > { %s3229_s4 = smov 128   ;;  %s2410_s13 = scalar_lea.hbm %s3172_s8, 16 }
  0x94   : > { %2189 = dma.hbm_to_vmem [thread:$0]  (!%p3227_p1), %s3169_s5, 512, %s354_s30, [#allocation11], %s3229_s4, %s3229_s4, %s3228_s26  }
  0x95   : > { %p2411_p6 = scmp.ne.s32.totalorder %s3172_s8, %s2410_s13  ;;  %p2417_p9 = scmp.lt.u32.totalorder %s2410_s13, %s3172_s8 }
  0x97   : > { %p2413_p12 = pnand %p2411_p6, %p3226_p3 }
  0x99   : > { %p2414_p8 = pneg %p2413_p12 }
  0x9b   : > { %p2419_p5 = pnand %p2417_p9, %p2414_p8 }
  0x9d   : > { %2422 = shalt.err (!%p2419_p5)
}
  0x9e   : > { %s2423_s17 = scalar_lea.vmem %s384_s1, 16  ;;  %s2430_s30 = scalar_lea.vmem %s384_s1, 32 }
  0x9f   : > { %p2424_p11 = scmp.ne.s32.totalorder %s384_s1, %s2423_s17  ;;  %p2431_p4 = scmp.lt.s32.totalorder %s384_s1, %s384_s1 }
  0xa0   : > { %p2432_p10 = scmp.lt.s32.totalorder %s2430_s30, %s2423_s17 }
  0xa1   : > { %p2426_p7 = pnand %p2424_p11, %p3226_p3 }
  0xa2   : > { %p2433_p13 = por %p2432_p10, %p2431_p4 }
  0xa3   : > { %p2427_p0 = pneg %p2426_p7 }
  0xa5   : > { %p2434_p2 = pnand %p2433_p13, %p2427_p0 }
  0xa7   : > { %2437 = shalt.err (!%p2434_p2)
}
  0xa8   : > { %2195 = dma.hbm_to_vmem [thread:$0]  (!%p3227_p1), %s3172_s8, 16, %s384_s1, [#allocation14]  }
  0xa9   : > { %s2913_s20 = scalar_lea.hbm %s3164_s0, %s2818_s10  ;;  %s404_s7 = scalar_lea.vmem [#allocation4], %s2822_s29 }
  0xaa   : > { %s412_s27 = sshll.u32 %s404_s7, 4  ;;  %s2922_s11 = scalar_lea.hbm %s3166_s2, %s2818_s10  ;;  %s2916_s27 = int_to_ptr.vmem [resolvable:$true] %s412_s27 }
  0xab   : > { %s3230_s22 = sand.u32 1, %s2580_s19   ;;  %s2438_s3 = scalar_lea.hbm %s2913_s20, 128 }
  0xac   : > { %s401_s1 = scalar_lea.sflag [#allocation5], %s3230_s22  ;;  %p2439_p2 = scmp.ne.s32.totalorder %s2913_s20, %s2438_s3 }
  0xad   : > { %p3231_p3 = scmp.ne.s32.totalorder %s3225_s21, 0  ;;  %s2443_s26 = scalar_lea.hbm %s3164_s0, 256 }
  0xae   : > { %p2444_p12 = scmp.lt.u32.totalorder %s2913_s20, %s3164_s0  ;;  %p2445_p8 = scmp.lt.u32.totalorder %s2443_s26, %s2438_s3 }
  0xaf   : > { %p2441_p1 = pnand %p2439_p2, %p3231_p3  ;;  %p2447_p5 = scmp.lt.u32.totalorder %s2438_s3, %s2913_s20 }
  0xb0   : > { %p2446_p9 = por %p2445_p8, %p2444_p12 }
  0xb1   : > { %p2442_p6 = pneg %p2441_p1 }
  0xb2   : > { %p2448_p11 = por %p2447_p5, %p2446_p9 }
  0xb4   : > { %p2449_p7 = pnand %p2448_p11, %p2442_p6 }
  0xb6   : > { %2452 = shalt.err (!%p2449_p7)
}
  0xb7   : > { %s2453_s10 = scalar_lea.vmem %s2916_s27, 128  ;;  %s2601_s28 = smov [#allocation4]  }
  0xb8   : > { %p2454_p0 = scmp.ne.s32.totalorder %s2916_s27, %s2453_s10  ;;  %s2458_s7 = sshll.u32 %s2601_s28, 4  ;;  %s2459_s7 = int_to_ptr.vmem [resolvable:$false] %s2458_s7 }
  0xb9   : > { %s2460_s13 = scalar_lea.vmem %s2459_s7, 256  ;;  %p2461_p13 = scmp.lt.s32.totalorder %s2916_s27, %s2459_s7 }
  0xba   : > { %p2456_p4 = pnand %p2454_p0, %p3231_p3  ;;  %p2462_p2 = scmp.lt.s32.totalorder %s2460_s13, %s2453_s10 }
  0xbc   : > { %p2457_p10 = pneg %p2456_p4  ;;  %p2463_p1 = por %p2462_p2, %p2461_p13 }
  0xbe   : > { %p2464_p12 = pnand %p2463_p1, %p2457_p10 }
  0xc0   : > { %2467 = shalt.err (!%p2464_p12)
}
  0xc1   : > { %p3232_p6 = scmp.ne.s32.totalorder %s3223_s12, 0  ;;  %s441_s14 = scalar_lea.vmem [#allocation9], %s2822_s29 }
  0xc2   : > { %s448_s22 = sshll.u32 %s441_s14, 4  ;;  %s2468_s3 = scalar_lea.hbm %s2922_s11, 128  ;;  %s449_s22 = int_to_ptr.vmem [resolvable:$true] %s448_s22 }
  0xc3   : > { %2199 = dma.hbm_to_vmem [thread:$0]  (!%p3232_p6), %s2913_s20, 128, %s2916_s27, %s401_s1  }
  0xc4   : > { %p2469_p8 = scmp.ne.s32.totalorder %s2922_s11, %s2468_s3  ;;  %s2473_s26 = scalar_lea.hbm %s3166_s2, 256 }
  0xc5   : > { %p2474_p11 = scmp.lt.u32.totalorder %s2922_s11, %s3166_s2  ;;  %p2475_p7 = scmp.lt.u32.totalorder %s2473_s26, %s2468_s3 }
  0xc6   : > { %p2471_p9 = pnand %p2469_p8, %p3231_p3  ;;  %p2477_p4 = scmp.lt.u32.totalorder %s2468_s3, %s2922_s11 }
  0xc7   : > { %p2476_p0 = por %p2475_p7, %p2474_p11 }
  0xc8   : > { %p2472_p5 = pneg %p2471_p9 }
  0xc9   : > { %p2478_p10 = por %p2477_p4, %p2476_p0 }
  0xcb   : > { %p2479_p13 = pnand %p2478_p10, %p2472_p5 }
  0xcd   : > { %2482 = shalt.err (!%p2479_p13)
}
  0xce   : > { %s2483_s29 = scalar_lea.vmem %s449_s22, 128  ;;  %s2602_s20 = smov [#allocation9]  }
  0xcf   : > { %p2484_p2 = scmp.ne.s32.totalorder %s449_s22, %s2483_s29  ;;  %s2488_s27 = sshll.u32 %s2602_s20, 4  ;;  %s2489_s27 = int_to_ptr.vmem [resolvable:$false] %s2488_s27 }
  0xd0   : > { %s2490_s1 = scalar_lea.vmem %s2489_s27, 256  ;;  %p2491_p8 = scmp.lt.s32.totalorder %s449_s22, %s2489_s27 }
  0xd1   : > { %p2486_p1 = pnand %p2484_p2, %p3231_p3  ;;  %p2492_p9 = scmp.lt.s32.totalorder %s2490_s1, %s2483_s29 }
  0xd3   : > { %p2487_p12 = pneg %p2486_p1  ;;  %p2493_p6 = por %p2492_p9, %p2491_p8 }
  0xd5   : > { %p2494_p7 = pnand %p2493_p6, %p2487_p12 }
  0xd7   : > { %2497 = shalt.err (!%p2494_p7)
}
  0xd8   : > { %p3233_p11 = scmp.ne.s32.totalorder %s3223_s12, 0  ;;  %p3234_p5 = scmp.ne.s32.totalorder %s3210_s24, 0 }
  0xd9   : > { %s2969_s21 = sand.u32 (!%p3234_p5), 1, %s2576_s18   ;;  %p3235_p3 = scmp.ne.s32.totalorder (!%p3234_p5), %s3217_s25, 0 }
  0xda   : > { %2205 = dma.hbm_to_vmem [thread:$0]  (!%p3233_p11), %s2922_s11, 128, %s449_s22, %s2840_s15  }
  0xdb   : > { %457 = sbr.rel (%p3234_p5) target bundleno = 1524 (0x5f4), region = 64  ;;  %s2972_s10 = sshll.u32 (!%p3234_p5), %s2969_s21, 3 }
  0xdc   : > { %s460_s28 = scalar_lea.sflag (!%p3234_p5), [#allocation5], %s2969_s21  ;;  %s463_s7 = scalar_lea.vmem (!%p3234_p5), [#allocation4], %s2972_s10 }
  0xe2   : > { %2551 = dma.done.wait (%p3235_p3), %s460_s28, 128  }
  0xe3   : > { %2553 = vsyncadd (%p3235_p3), %s460_s28, 4294967168  ;;  %s468_s24 = sand.u32 1, %s2701_s23   ;;  %s472_s15 = scalar_lea.vmem [#allocation7], %s2972_s10 }
  0xe4   : > { %s469_s12 = scalar_lea.sflag [#allocation8], %s468_s24 }
  0xe5   : > { %2555 = dma.done.wait (%p3235_p3), %s469_s12, 256  }
  0xe6   : > { %2557 = vsyncadd (%p3235_p3), %s469_s12, 4294967040  ;;  %s481_s11 = scalar_lea.vmem [#allocation9], %s2972_s10  ;;  %p3236_p6 = scmp.eq.s32.totalorder %s2701_s23, 0 }
  0xe8   : > { %2559 = dma.done.wait (%p3236_p6), [#allocation11], 1024   ;;  %p3237_p0 = pmov %p3236_p6 }
  0xea   : > { %2561 = vsyncadd (%p3237_p0), [#allocation11], 4294966272  ;;  %p3238_p4 = pmov %p3237_p0 }
  0xeb   : > { %p3239_p10 = pmov %p3237_p0 }
  0xec   : > { %2563 = dma.done.wait (%p3238_p4), [#allocation14], 528  }
  0xed   : > { %2565 = vsyncadd (%p3239_p10), [#allocation14], 4294966768  ;;  %v2603_v0 = vmov 0.0|0.0   ;;  %vm2604_vm0 = vmmov 0   ;;  %v2605_v1 = vmov 0.0   ;;  %v638_v2 = vld [vmem:[#allocation13] sm:$0xff] }
  0xee   : > { %2147 = vmatprep.subr.bf16.mxu1 %v2603_v0  ;;  %2067 = vmatprep.mubr.msk.f32.mxu1 %vm2604_vm0, %v2605_v1  ;;  %v639_v3 = vld [vmem:[#allocation13 + $0x8] sm:$0xff]  ;;  %v640_v4 = vld [vmem:[#allocation13 + $0x10] sm:$0xff]  ;;  %v641_v6 = vld [vmem:[#allocation13 + $0x18] sm:$0xff]  ;;  %vm562_vm1 = vcmask 261120   ;;  %vm723_vm2 = vcmask 64512   ;;  %s2606_s26 = smov 104  }
  0xef   : > { %2141 = vmatprep.subr.bf16.mxu0 %v2603_v0  ;;  %2056 = vmatprep.mubr.msk.f32.mxu0 %vm2604_vm0, %v2605_v1  ;;  %v2148_v5 = vpack.c.bf16 %v639_v3, %v638_v2  ;;  %v551_v7 = vld [vmem:[#allocation12] sm:$0xff]  ;;  %v552_v8 = vld [vmem:[#allocation12 + $0x8] sm:$0xff]  ;;  %v553_v9 = vld [vmem:[#allocation12 + $0x10] sm:$0xff]  ;;  %v2151_v11 = vpack.c.bf16 %v641_v6, %v640_v4  ;;  %s2607_s4 = smov 112   ;;  %s2608_s16 = smov 120  }
  0xf0   : > { %v554_v10 = vld [vmem:[#allocation12 + $0x18] sm:$0xff]  ;;  %v2142_v12 = vpack.c.bf16 %v552_v8, %v551_v7  ;;  %v550_v15 = vld [vmem:[%s472_s15] sm:$0xff]  ;;  %v798_v17 = vld [vmem:[%s3173_s9 + $0x8] sm:$0xff]  ;;  %s3240_s28 = sld [smem:[#allocation32_spill]]  ;;  %s3242_s24 = sld [smem:[#allocation27_spill]] }
  0xf1   : > { %2149 = vmatpush3.bf16.msra.mxu1 %v2148_v5  ;;  %v2145_v13 = vpack.c.bf16 %v554_v10, %v553_v9  ;;  %v637_v14 = vld [vmem:[%s481_s11] sm:$0xff]  ;;  %v722_v16 = vld [vmem:[%s3173_s9] sm:$0xff]  ;;  %v1984_v18 = vld [vmem:[#allocation15] ss:$0 sm:$0xff]  ;;  %s3243_s11 = sld [smem:[#allocation34_spill]]  ;;  %s545_s25 = scalar_lea.vmem [#allocation16], %s2972_s10 }
  0xf2   : > { %2150 = vmatprep.subr.bf16.mxu1 %v2603_v0  ;;  %2143 = vmatpush3.bf16.msra.mxu0 %v2142_v12  ;;  %v1982_v20 = vld [vmem:[%s3170_s6] ss:$0 sm:$0xff]  ;;  %v875_v23 = vld [vmem:[%s3173_s9 + $0x10] sm:$0xff]  ;;  %v1030_v28 = vld [vmem:[#allocation10] sm:$0xff]  ;;  %s1798_s13 = sshll.u32 %s545_s25, 4  ;;  %s3244_s3 = sld [smem:[#allocation35_spill]]  ;;  %s3116_s13 = int_to_ptr.vmem [resolvable:$true] %s1798_s13 }
  0xf3   : > { %2144 = vmatprep.subr.bf16.mxu0 %v2603_v0  ;;  %v1031_v29 = vld [vmem:[#allocation10 + $0x8] sm:$0xff]  ;;  %v1032_v31 = vld [vmem:[#allocation10 + $0x10] sm:$0xff]  ;;  %v1033_v32 = vld [vmem:[#allocation10 + $0x18] sm:$0xff]  ;;  %s1784_s30 = scalar_lea.sflag [#allocation6], %s2969_s21  ;;  %s2609_s10 = smov [#allocation16]  }
  0xf4   : > { %v2154_v30 = vpack.c.bf16 %v1031_v29, %v1030_v28  ;;  %v2157_v34 = vpack.c.bf16 %v1033_v32, %v1032_v31  ;;  %v952_v35 = vld [vmem:[%s3173_s9 + $0x18] sm:$0xff]  ;;  %v1029_v37 = vld [vmem:[%s463_s7] sm:$0xff]  ;;  %s3241_s7 = sld [smem:[#allocation23_spill]] }
  0xf5   : > { %2152 = vmatpush3.bf16.msra.mxu1 %v2151_v11 }
  0xf6   : > { %2075 = vmatprep.subr.mxu1 %v2605_v1  ;;  %2146 = vmatpush3.bf16.msra.mxu0 %v2145_v13  ;;  %v1990_v46 = vld [vmem:[%s3240_s28] ss:$0 sm:$0xff]  ;;  %p3245_p2 = scmp.ne.s32.totalorder %s3242_s24, 0 }
  0xf7   : > { %2070 = vmatprep.subr.mxu0 %v2605_v1 }
  0xf8   : > { %2068 = vmatmul.mubr.msk.f32.vlgmr.msra.gmra.mrb[0].mxu1 %vm562_vm1, %v637_v14 }
  0xf9   : > { %2077 = vmatprep.mubr.msk.f32.mxu1 %vm2604_vm0, %v2605_v1  ;;  %2057 = vmatmul.mubr.msk.f32.vlgmr.msra.gmra.mrb[0].mxu0 %vm562_vm1, %v550_v15 }
  0xfa   : > { %2072 = vmatprep.mubr.msk.f32.mxu0 %vm2604_vm0, %v2605_v1  ;;  %2071 = vmatpush3.msra.mxu0 %v722_v16  ;;  %s2006_s23 = sshll.u32 %s3241_s7, 7 }
  0xfb   : > { %2080 = vmatprep.subr.mxu0 %v2605_v1  ;;  %2076 = vmatpush3.msra.mxu1 %v798_v17  ;;  %s3114_s17 = scalar_lea.hbm %s3244_s3, %s2006_s23 }
  0xfc   : > { %2085 = vmatprep.subr.mxu1 %v2605_v1 }
 0x1cb   : > { %v718_v19 = vpop.f32.mrb[0].mxu1 }
 0x1cc   : > { %v719_v21 = vadd.f32 %v1984_v18, %v718_v19  ;;  %v2069_v22 = vpop.f32.mrb[1].mxu1  ;;  %v632_v24 = vpop.f32.mrb[0].mxu0 }
 0x1cd   : > { %v633_v25 = vadd.f32 %v1982_v20, %v632_v24  ;;  %v2058_v26 = vpop.f32.mrb[1].mxu0 }
 0x1ce   : > { %953 = vrot.lane.b32.xlu1 %v719_v21, %s2606_s26  ;;  %876 = vrot.lane.b32.xlu0 %v719_v21, %s2607_s4 }
 0x1cf   : > { %2073 = vmatmul.mubr.msk.f32.vlgmr.msra.gmra.mrb[2].mxu0 %vm723_vm2, %v719_v21  ;;  %636 = vst.msk [vmem:[#allocation2] sm:$0xff] %vm562_vm1, %v633_v25 }
 0x1d0   : > { %2081 = vmatpush3.msra.mxu0 %v875_v23  ;;  %2082 = vmatprep.mubr.msk.f32.mxu0 %vm2604_vm0, %v2605_v1 }
 0x1d1   : > { %2153 = vmatprep.subr.bf16.mxu0 %v2603_v0 }
 0x1d2   : > { %799 = vrot.lane.b32.xlu0 %v719_v21, %s2608_s16 }
 0x1d6   : > { %v1115_v27 = vld [vmem:[#allocation2] sm:$0xff] }
 0x1d7   : > { %1281 = vrot.lane.b32.xlu1 %v1115_v27, %s2608_s16 }
 0x1db   : > { %1446 = vrot.lane.b32.xlu1 %v1115_v27, %s2607_s4 }
 0x1df   : > { %1611 = vrot.lane.b32.xlu1 %v1115_v27, %s2606_s26 }
 0x240   : > { %v877_v33 = vpop.permute.xlu0 %876  ;;  %v954_v38 = vpop.permute.xlu1 %953 }
 0x241   : > { %2083 = vmatmul.mubr.msk.f32.vlgmr.msra.gmra.mrb[4].mxu0 %vm723_vm2, %v877_v33 }
 0x242   : > { %2155 = vmatpush3.bf16.msra.mxu0 %v2154_v30  ;;  %2098 = vmatprep.mubr.msk.f32.mxu0 %vm2604_vm0, %v2605_v1 }
 0x243   : > { %2156 = vmatprep.subr.bf16.mxu0 %v2603_v0 }
 0x244   : > { %v800_v36 = vpop.permute.xlu0 %799 }
 0x245   : > { %2078 = vmatmul.mubr.msk.f32.vlgmr.msra.gmra.mrb[2].mxu1 %vm723_vm2, %v800_v36 }
 0x246   : > { %2158 = vmatpush3.bf16.msra.mxu0 %v2157_v34  ;;  %2086 = vmatpush3.msra.mxu1 %v952_v35 }
 0x247   : > { %2087 = vmatprep.mubr.msk.f32.mxu1 %vm2604_vm0, %v2605_v1  ;;  %2101 = vmatprep.subr.mxu1 %v2605_v1 }
 0x248   : > { %2111 = vmatprep.subr.mxu0 %v2605_v1 }
 0x249   : > { %2099 = vmatmul.mubr.msk.f32.vlgmr.msra.gmra.mrb[6].mxu0 %vm562_vm1, %v1029_v37  ;;  %2088 = vmatmul.mubr.msk.f32.vlgmr.msra.gmra.mrb[4].mxu1 %vm723_vm2, %v954_v38  ;;  %v1282_v41 = vpop.permute.xlu1 %1281 }
 0x24a   : > { %2103 = vmatprep.mubr.msk.f32.mxu1 %vm2604_vm0, %v2605_v1  ;;  %2113 = vmatprep.mubr.msk.f32.mxu0 %vm2604_vm0, %v2605_v1 }
 0x24d   : > { %2102 = vmatpush3.xpose.msk.msra.mxu1 %vm723_vm2, %v1115_v27  ;;  %v1447_v53 = vpop.permute.xlu1 %1446 }
 0x24e   : > { %2106 = vmatprep.subr.mxu1 %v2605_v1 }
 0x24f   : > { %2112 = vmatpush3.xpose.msk.msra.mxu0 %vm723_vm2, %v1282_v41 }
 0x250   : > { %2121 = vmatprep.subr.mxu0 %v2605_v1 }
 0x251   : > { %v1612_v56 = vpop.permute.xlu1 %1611 }
 0x2a2   : > { %v793_v39 = vpop.f32.mrb[2].mxu0 }
 0x2a3   : > { %797 = vst.msk [vmem:[#allocation3] sm:$0xff] %vm562_vm1, %v793_v39  ;;  %v2074_v40 = vpop.f32.mrb[3].mxu0 }
 0x2aa   : > { %v1203_v52 = vld [vmem:[#allocation3] sm:$0xff] }
 0x314   : > { %v946_v42 = vpop.f32.mrb[4].mxu0 }
 0x315   : > { %951 = vst.msk [vmem:[#allocation3 + $0x10] sm:$0xff] %vm562_vm1, %v946_v42  ;;  %v2084_v43 = vpop.f32.mrb[5].mxu0 }
 0x318   : > { %v869_v44 = vpop.f32.mrb[2].mxu1 }
 0x319   : > { %874 = vst.msk [vmem:[#allocation3 + $0x8] sm:$0xff] %vm562_vm1, %v869_v44  ;;  %v2079_v45 = vpop.f32.mrb[3].mxu1 }
 0x31c   : > { %v1111_v47 = vpop.f32.mrb[6].mxu0  ;;  %v1023_v48 = vpop.f32.mrb[4].mxu1  ;;  %v1533_v23 = vld [vmem:[#allocation3 + $0x10] sm:$0xff] }
 0x31d   : > { %v1112_v49 = vadd.f32 %v1990_v46, %v1111_v47  ;;  %1028 = vst.msk [vmem:[#allocation3 + $0x18] sm:$0xff] %vm562_vm1, %v1023_v48  ;;  %v2100_v50 = vpop.f32.mrb[7].mxu0  ;;  %v2089_v51 = vpop.f32.mrb[5].mxu1 }
 0x31e   : > { %v2004_v51 = vld [vmem:[%s3243_s11] ss:$0 sm:$0xff] }
 0x31f   : > { %1279 = vrot.lane.b32.xlu0 %v1112_v49, %s2608_s16  ;;  %2104 = vmatmul.mubr.msk.f32.vlgmr.msra.gmra.mrb[6].mxu1 %vm723_vm2, %v1112_v49 }
 0x320   : > { %2107 = vmatpush3.msra.mxu1 %v1203_v52  ;;  %2108 = vmatprep.mubr.msk.f32.mxu1 %vm2604_vm0, %v2605_v1  ;;  %v1368_v11 = vld [vmem:[#allocation3 + $0x8] sm:$0xff] }
 0x321   : > { %2116 = vmatprep.subr.mxu1 %v2605_v1 }
 0x323   : > { %1444 = vrot.lane.b32.xlu0 %v1112_v49, %s2607_s4  ;;  %s2502_s4 = sshll.u32 %s2609_s10, 4  ;;  %s2503_s4 = int_to_ptr.vmem [resolvable:$false] %s2502_s4 }
 0x324   : > { %v1698_v26 = vld [vmem:[#allocation3 + $0x18] sm:$0xff]  ;;  %s2504_s16 = scalar_lea.vmem %s2503_s4, 256  ;;  %p2505_p8 = scmp.lt.s32.totalorder %s3116_s13, %s2503_s4 }
 0x327   : > { %1609 = vrot.lane.b32.xlu0 %v1112_v49, %s2606_s26  ;;  %s2498_s26 = scalar_lea.vmem %s3116_s13, 128 }
 0x328   : > { %p2499_p13 = scmp.ne.s32.totalorder %s3116_s13, %s2498_s26  ;;  %p2506_p9 = scmp.lt.s32.totalorder %s2504_s16, %s2498_s26 }
 0x32a   : > { %p2500_p1 = pnand %p2499_p13, %p3245_p2  ;;  %p2507_p7 = por %p2506_p9, %p2505_p8 }
 0x32c   : > { %p2501_p12 = pneg %p2500_p1 }
 0x32e   : > { %p2508_p11 = pnand %p2507_p7, %p2501_p12 }
 0x391   : > { %v1280_v54 = vpop.permute.xlu0 %1279 }
 0x392   : > { %2114 = vmatmul.mubr.msk.f32.vlgmr.msra.gmra.mrb[8].mxu0 %vm723_vm2, %v1280_v54 }
 0x393   : > { %2122 = vmatpush3.xpose.msk.msra.mxu0 %vm723_vm2, %v1447_v53  ;;  %2123 = vmatprep.mubr.msk.f32.mxu0 %vm2604_vm0, %v2605_v1 }
 0x394   : > { %2131 = vmatprep.subr.mxu0 %v2605_v1 }
 0x395   : > { %v1445_v55 = vpop.permute.xlu0 %1444 }
 0x396   : > { %2124 = vmatmul.mubr.msk.f32.vlgmr.msra.gmra.mrb[10].mxu0 %vm723_vm2, %v1445_v55 }
 0x397   : > { %2132 = vmatpush3.xpose.msk.msra.mxu0 %vm723_vm2, %v1612_v56  ;;  %2133 = vmatprep.mubr.msk.f32.mxu0 %vm2604_vm0, %v2605_v1 }
 0x399   : > { %v1610_v57 = vpop.permute.xlu0 %1609 }
 0x39a   : > { %2134 = vmatmul.mubr.msk.f32.vlgmr.msra.gmra.mrb[12].mxu0 %vm723_vm2, %v1610_v57 }
 0x3f2   : > { %v1189_v58 = vpop.f32.mrb[6].mxu1 }
 0x3f3   : > { %v2105_v59 = vpop.f32.mrb[7].mxu1  ;;  %v1193_v60 = vsel %vm723_vm2, %v1189_v58, -inf }
 0x3f4   : > { %1194 = vmax.xlane.f32.xlu1 %v1193_v60 }
 0x465   : > { %v1353_v61 = vpop.f32.mrb[8].mxu0 }
 0x466   : > { %v2115_v62 = vpop.f32.mrb[9].mxu0  ;;  %v1357_v63 = vsel %vm723_vm2, %v1353_v61, -inf }
 0x467   : > { %1358 = vmax.xlane.f32.xlu0 %v1357_v63 }
 0x469   : > { %v1518_v0 = vpop.f32.mrb[10].mxu0 }
 0x46a   : > { %v2125_v2 = vpop.f32.mrb[11].mxu0  ;;  %v1522_v3 = vsel %vm723_vm2, %v1518_v0, -inf }
 0x46b   : > { %1523 = vmax.xlane.f32.xlu0 %v1522_v3 }
 0x46d   : > { %v1683_v4 = vpop.f32.mrb[12].mxu0 }
 0x46e   : > { %v2135_v5 = vpop.f32.mrb[13].mxu0  ;;  %v1687_v6 = vsel %vm723_vm2, %v1683_v4, -inf }
 0x46f   : > { %1688 = vmax.xlane.f32.xlu1 %v1687_v6 }
 0x481   : > { %v1195_v7 = vpop.xlane.xlu1 %1194 }
 0x482   : > { %v1196_v8 = vsub.f32 %v1189_v58, %v1195_v7 }
 0x484   : > { %v1197_v9 = vmul.f32 1.442695, %v1196_v8 }
 0x486   : > { %2280 = vpow2.f32 %v1197_v9 }
 0x490   : > { %v2281_v10 = vpop.eup %2280 }
 0x491   : > { %2109 = vmatmul.mubr.msk.f32.vlgmr.msra.gmra.mrb[8].mxu1 %vm723_vm2, %v2281_v10  ;;  %v1199_v12 = vsel %vm723_vm2, %v2281_v10, 0.0 }
 0x492   : > { %2117 = vmatpush3.msra.mxu1 %v1368_v11  ;;  %1200 = vadd.xlane.f32.xlu0 %v1199_v12 }
 0x493   : > { %2118 = vmatprep.mubr.msk.f32.mxu1 %vm2604_vm0, %v2605_v1  ;;  %2126 = vmatprep.subr.mxu1 %v2605_v1 }
 0x4f4   : > { %v1359_v13 = vpop.xlane.xlu0 %1358 }
 0x4f5   : > { %v1360_v14 = vsub.f32 %v1353_v61, %v1359_v13 }
 0x4f7   : > { %v1361_v15 = vmul.f32 1.442695, %v1360_v14 }
 0x4f8   : > { %v1524_v16 = vpop.xlane.xlu0 %1523 }
 0x4f9   : > { %2282 = vpow2.f32 %v1361_v15  ;;  %v1525_v17 = vsub.f32 %v1518_v0, %v1524_v16 }
 0x4fb   : > { %v1526_v18 = vmul.f32 1.442695, %v1525_v17 }
 0x4fc   : > { %v1689_v19 = vpop.xlane.xlu1 %1688 }
 0x4fd   : > { %2284 = vpow2.f32 %v1526_v18  ;;  %v1690_v20 = vsub.f32 %v1683_v4, %v1689_v19 }
 0x4ff   : > { %v1691_v21 = vmul.f32 1.442695, %v1690_v20 }
 0x501   : > { %2286 = vpow2.f32 %v1691_v21 }
 0x503   : > { %v2283_v22 = vpop.eup %2282 }
 0x504   : > { %2119 = vmatmul.mubr.msk.f32.vlgmr.msra.gmra.mrb[10].mxu1 %vm723_vm2, %v2283_v22  ;;  %v1363_v24 = vsel %vm723_vm2, %v2283_v22, 0.0 }
 0x505   : > { %2127 = vmatpush3.msra.mxu1 %v1533_v23  ;;  %1364 = vadd.xlane.f32.xlu1 %v1363_v24 }
 0x506   : > { %2128 = vmatprep.mubr.msk.f32.mxu1 %vm2604_vm0, %v2605_v1  ;;  %2136 = vmatprep.subr.mxu1 %v2605_v1 }
 0x507   : > { %v2285_v25 = vpop.eup %2284 }
 0x508   : > { %2129 = vmatmul.mubr.msk.f32.vlgmr.msra.gmra.mrb[12].mxu1 %vm723_vm2, %v2285_v25  ;;  %v1528_v27 = vsel %vm723_vm2, %v2285_v25, 0.0 }
 0x509   : > { %2137 = vmatpush3.msra.mxu1 %v1698_v26  ;;  %1529 = vadd.xlane.f32.xlu0 %v1528_v27 }
 0x50a   : > { %2138 = vmatprep.mubr.msk.f32.mxu1 %vm2604_vm0, %v2605_v1 }
 0x50b   : > { %v2287_v28 = vpop.eup %2286 }
 0x50c   : > { %2139 = vmatmul.mubr.msk.f32.vlgmr.msra.gmra.mrb[14].mxu1 %vm723_vm2, %v2287_v28  ;;  %v1693_v29 = vsel %vm723_vm2, %v2287_v28, 0.0 }
 0x50d   : > { %1694 = vadd.xlane.f32.xlu1 %v1693_v29 }
 0x51f   : > { %v1201_v32 = vpop.xlane.xlu0 %1200 }
 0x520   : > { %2288 = vrcp.f32 %v1201_v32 }
 0x52a   : > { %v2289_v36 = vpop.eup %2288 }
 0x564   : > { %v1273_v30 = vpop.f32.mrb[8].mxu1 }
 0x565   : > { %v2110_v31 = vpop.f32.mrb[9].mxu1  ;;  %v1277_v38 = vmul.f32 %v2289_v36, %v1273_v30 }
 0x592   : > { %v1365_v33 = vpop.xlane.xlu1 %1364 }
 0x593   : > { %2290 = vrcp.f32 %v1365_v33 }
 0x596   : > { %v1530_v34 = vpop.xlane.xlu0 %1529 }
 0x597   : > { %2292 = vrcp.f32 %v1530_v34 }
 0x59a   : > { %v1695_v35 = vpop.xlane.xlu1 %1694 }
 0x59b   : > { %2294 = vrcp.f32 %v1695_v35 }
 0x59d   : > { %v2291_v37 = vpop.eup %2290 }
 0x5a1   : > { %v2293_v42 = vpop.eup %2292 }
 0x5a5   : > { %v2295_v47 = vpop.eup %2294 }
 0x5d7   : > { %v1438_v1 = vpop.f32.mrb[10].mxu1 }
 0x5d8   : > { %v1442_v39 = vmul.f32 %v2291_v37, %v1438_v1  ;;  %v2120_v40 = vpop.f32.mrb[11].mxu1 }
 0x5da   : > { %v1443_v41 = vadd.f32 %v1442_v39, %v1277_v38 }
 0x5db   : > { %v1603_v43 = vpop.f32.mrb[12].mxu1 }
 0x5dc   : > { %v1607_v44 = vmul.f32 %v2293_v42, %v1603_v43  ;;  %v2130_v45 = vpop.f32.mrb[13].mxu1 }
 0x5de   : > { %v1608_v46 = vadd.f32 %v1607_v44, %v1443_v41 }
 0x5df   : > { %v1768_v48 = vpop.f32.mrb[14].mxu1 }
 0x5e0   : > { %v1772_v49 = vmul.f32 %v2295_v47, %v1768_v48  ;;  %v2140_v50 = vpop.f32.mrb[15].mxu1 }
 0x5e2   : > { %v1773_v52 = vadd.f32 %v1772_v49, %v1608_v46 }
 0x5e4   : > { %v1781_v53 = vadd.f32 %v2004_v51, %v1773_v52 }
 0x5e6   : > { %1782 = vst.msk [vmem:[%s545_s25] sm:$0xff] %vm562_vm1, %v1781_v53 }
 0x5e7   : > { %2511 = shalt.err (!%p2508_p11)
}
 0x5e8   : > { %s2512_s21 = scalar_lea.hbm %s3114_s17, 128  ;;  %s2516_s27 = scalar_lea.hbm %s3244_s3, 256 }
 0x5e9   : > { %p2513_p5 = scmp.ne.s32.totalorder %s3114_s17, %s2512_s21  ;;  %p2517_p0 = scmp.lt.u32.totalorder %s3114_s17, %s3244_s3 }
 0x5ea   : > { %p2518_p4 = scmp.lt.u32.totalorder %s2516_s27, %s2512_s21  ;;  %p2520_p13 = scmp.lt.u32.totalorder %s2512_s21, %s3114_s17 }
 0x5eb   : > { %p2514_p3 = pnand %p2513_p5, %p3245_p2 }
 0x5ec   : > { %p2519_p10 = por %p2518_p4, %p2517_p0 }
 0x5ed   : > { %p2515_p6 = pneg %p2514_p3 }
 0x5ee   : > { %p2521_p1 = por %p2520_p13, %p2519_p10 }
 0x5f0   : > { %p2522_p12 = pnand %p2521_p1, %p2515_p6 }
 0x5f2   : > { %2525 = shalt.err (!%p2522_p12)
}
 0x5f3   : > { %2181 = dma.vmem_to_hbm [thread:$0]  (%p3245_p2), %s3116_s13, 128, %s3114_s17, %s1784_s30  }
 0x5f4 PF: > { %s3246_s7 = sld [smem:[#allocation22_spill]]  ;;  %s3247_s12 = sld [smem:[#allocation29_spill]] }
 0x5f5   : > { %s3248_s15 = sld [smem:[#allocation25_spill]] }
 0x5fa   : > { %s1810_s11 = sand.u32 1, %s3246_s7   ;;  %p3249_p8 = scmp.ne.s32.totalorder %s3247_s12, 0 }
 0x5fb   : > { %p3250_p9 = scmp.ge.s32.totalorder %s3248_s15, 2  ;;  %s1811_s23 = scalar_lea.sflag [#allocation6], %s1810_s11 }
 0x5fd   : > { %p2207_p7 = pnand %p3250_p9, %p3249_p8 }
 0x5ff   : > { %2567 = dma.done.wait (!%p2207_p7), %s1811_s23, 128  }
 0x600   : > { %2569 = vsyncadd (!%p2207_p7), %s1811_s23, 4294967168  ;;  %s32_s22 = sadd.s32 1, %s3248_s15   ;;  %s3251_s24 = sld [smem:[#allocation28_spill]] }
 0x601   : > { %p29_p11 = scmp.ge.s32.totalorder %s32_s22, 4   ;;  %s3252_s20 = sld [smem:[#allocation24_spill]] }
 0x602   : > { %s3253_s21 = sld [smem:[#allocation26_spill]]  ;;  %s3254_s17 = smov %s2576_s18 }
 0x603   : > { %s3255_s18 = smov %s2580_s19  ;;  %31 = sbr.rel (!%p29_p11) target bundleno = 17 (0x11), region = 159 }
 0x606   : > { %s3256_s19 = smov %s3251_s24 }
 0x60a   :  { %1816 = vsyncpa [#allocation5], 1 }
 0x60b   :  { %1818 = vsyncpa [#allocation5 + $0x1], 1 }
 0x60c   :  { %1819 = vsyncpa [#allocation8], 1 }
 0x60d   :  { %1821 = vsyncpa [#allocation8 + $0x1], 1 }
 0x60e   :  { %1822 = vsyncpa [#allocation11], 1 }
 0x60f   :  { %1823 = vsyncpa [#allocation14], 1 }
 0x610   :  { %1824 = vsyncpa [#allocation6], 1 }
 0x611   :  { %1826 = vsyncpa [#allocation6 + $0x1], 1 }

</bundles_post_ra>
